<compile_context>
chip_gen: v7x
topology: tpu7x:2x2x1
jax: 0.10.0
libtpu: 0.0.40
codegen_flags: <defaults>
</compile_context>

<pallas_src>
import functools

import jax
import jax.numpy as jnp
from jax.experimental import pallas as pl
from jax.experimental.pallas import tpu as pltpu

IN_FEATURES = 512
HIDDEN = 512
LANE = 128
MAX_BM = 256  # batch-tile rows (multiple of 8; 256 keeps VMEM tiny everywhere)


def _round_up(n, m):
    return ((n + m - 1) // m) * m


def _scene_kernel(head_pad, x_ref, w1_ref, wh_ref, bias_ref, out_ref):
    # fc1 + ReLU: bf16 x bf16 matmul on the MXU, f32 accumulation.
    h = jnp.dot(x_ref[...], w1_ref[...], preferred_element_type=jnp.float32)
    h = jnp.maximum(h + bias_ref[0:1, :HIDDEN], 0.0)

    # Fused (policy || value || zero-pad) head: single lane-dense matmul.
    out = jnp.dot(h.astype(jnp.bfloat16), wh_ref[...],
                  preferred_element_type=jnp.float32)
    out_ref[...] = (out + bias_ref[1:2, :head_pad]).astype(out_ref.dtype)


def scene_specific_forward(x, packed, out_dtype=jnp.float32):
    """x: (B, 512) float (any float dtype).  Returns (policy (B, A), value (1,))."""
    w1 = packed["w1"]        # (512, 512) bf16
    wh = packed["wh"]        # (512, HEAD_PAD) bf16: policy cols, value col, zeros
    bias = packed["bias"]    # (2, BW) f32: row0 = b1, row1 = bp||bv||0
    A = packed["action_space_size"]
    head_pad = wh.shape[1]
    bw = bias.shape[1]
    B = x.shape[0]

    # Cast activations to bf16 in the wrapper (halves activation HBM traffic,
    # no in-kernel cast); pad batch to a multiple of the batch tile.
    bm = min(MAX_BM, _round_up(B, 8))
    b_pad = _round_up(B, bm)
    x = x.astype(jnp.bfloat16)
    if b_pad != B:
        x = jnp.pad(x, ((0, b_pad - B), (0, 0)))

    n_tiles = b_pad // bm
    flops = 2 * b_pad * HIDDEN * (IN_FEATURES + head_pad)
    bytes_accessed = (x.size * x.dtype.itemsize
                      + w1.size * w1.dtype.itemsize
                      + wh.size * wh.dtype.itemsize
                      + bias.size * bias.dtype.itemsize
                      + b_pad * head_pad * jnp.dtype(out_dtype).itemsize)

    out = pl.pallas_call(
        functools.partial(_scene_kernel, head_pad),
        out_shape=jax.ShapeDtypeStruct((b_pad, head_pad), out_dtype),
        grid_spec=pltpu.PrefetchScalarGridSpec(
            num_scalar_prefetch=0,
            grid=(n_tiles,),
            in_specs=[
                # batch tile streams; weights/bias are VMEM-resident (constant
                # index_map -> fetched from HBM once per call).
                pl.BlockSpec((bm, IN_FEATURES), lambda i: (i, 0)),
                pl.BlockSpec((IN_FEATURES, HIDDEN), lambda i: (0, 0)),
                pl.BlockSpec((HIDDEN, head_pad), lambda i: (0, 0)),
                pl.BlockSpec((2, bw), lambda i: (0, 0)),
            ],
            out_specs=pl.BlockSpec((bm, head_pad), lambda i: (i, 0)),
        ),
        compiler_params=pltpu.CompilerParams(
            dimension_semantics=("parallel",)),
        cost_estimate=pl.CostEstimate(
            flops=flops, transcendentals=0, bytes_accessed=bytes_accessed),
    )(x, w1, wh, bias)

    out = out[:B].astype(jnp.float32)
    policy = out[:, :A]
    # PyTorch: x_value = self.fc2_value(x)[0]  -> first batch row, shape (1,)
    value = out[0, A:A + 1]
    return policy, value


def init_params(key, action_space_size):
    """Deterministic synthetic parameters (PyTorch-Linear-like uniform init).

    Weights are (in_features, out_features), i.e. W.T of the nn.Linear weight,
    so the kernel computes x @ W + b directly.
    """
    ks = jax.random.split(key, 6)

    def uni(k, shape, fan_in):
        bound = 1.0 / jnp.sqrt(fan_in)
        return jax.random.uniform(k, shape, jnp.float32, -bound, bound)

    return {
        "w1": uni(ks[0], (IN_FEATURES, HIDDEN), IN_FEATURES),
        "b1": uni(ks[1], (HIDDEN,), IN_FEATURES),
        "wp": uni(ks[2], (HIDDEN, action_space_size), HIDDEN),
        "bp": uni(ks[3], (action_space_size,), HIDDEN),
        "wv": uni(ks[4], (HIDDEN, 1), HIDDEN),
        "bv": uni(ks[5], (1,), HIDDEN),
    }


def pack_params(params):
    """Fuse / pad / downcast parameters into kernel-ready slabs."""
    A = params["wp"].shape[1]
    head_cols = A + 1
    head_pad = max(LANE, _round_up(head_cols, LANE))
    bw = max(HIDDEN, head_pad)

    # Fused head weight: [policy | value | zero-pad] -> (512, head_pad), bf16.
    wh = jnp.zeros((HIDDEN, head_pad), jnp.float32)
    wh = wh.at[:, :A].set(params["wp"]).at[:, A:A + 1].set(params["wv"])

    # Bias slab (f32): row 0 = b1 (padded to bw), row 1 = bp||bv||0.
    bias = jnp.zeros((2, bw), jnp.float32)
    bias = bias.at[0, :HIDDEN].set(params["b1"])
    bias = bias.at[1, :A].set(params["bp"]).at[1, A:A + 1].set(params["bv"])

    return {
        "w1": params["w1"].astype(jnp.bfloat16),
        "wh": wh.astype(jnp.bfloat16),
        "bias": bias,
        "action_space_size": A,
    }


def reference_forward(x, packed):
    """Pure-JAX reference matching the PyTorch forward, mimicking the kernel's
    bf16 casts so the comparison is tight."""
    A = packed["action_space_size"]
    head_pad = packed["wh"].shape[1]
    w1 = packed["w1"].astype(jnp.float32)
    wh = packed["wh"].astype(jnp.float32)
    b1 = packed["bias"][0, :HIDDEN]
    bh = packed["bias"][1, :head_pad]

    xb = x.astype(jnp.bfloat16).astype(jnp.float32)
    h = jnp.maximum(xb @ w1 + b1, 0.0)
    hb = h.astype(jnp.bfloat16).astype(jnp.float32)
    out = hb @ wh + bh
    return out[:, :A], out[0, A:A + 1]


if __name__ == "__main__":
    key = jax.random.PRNGKey(0)
    k_param, k_x, k_xbig = jax.random.split(key, 3)

    batch = 2
    action_space_size = 4

    params = init_params(k_param, action_space_size)
    packed = pack_params(params)
    x = jax.random.normal(k_x, (batch, IN_FEATURES), dtype=jnp.float32)

    pol, val = scene_specific_forward(x, packed)
    pol, val = jax.block_until_ready((pol, val))

    ref_pol, ref_val = reference_forward(x, packed)
    assert pol.shape == (batch, action_space_size)
    assert val.shape == (1,)
    assert jnp.allclose(pol, ref_pol, atol=1e-3, rtol=1e-3)
    assert jnp.allclose(val, ref_val, atol=1e-3, rtol=1e-3)

    # Sanity vs. the full-f32 PyTorch-equivalent math (looser: bf16 weights).
    h_f32 = jnp.maximum(x @ params["w1"] + params["b1"], 0.0)
    pol_f32 = h_f32 @ params["wp"] + params["bp"]
    val_f32 = (h_f32 @ params["wv"] + params["bv"])[0]
    assert jnp.allclose(pol, pol_f32, atol=5e-2, rtol=5e-2)
    assert jnp.allclose(val, val_f32, atol=5e-2, rtol=5e-2)

    # Exercise the batched (multi-tile, padded) rollout path as well.
    x_big = jax.random.normal(k_xbig, (300, IN_FEATURES), dtype=jnp.float32)
    pol_b, val_b = scene_specific_forward(x_big, packed)
    pol_b, val_b = jax.block_until_ready((pol_b, val_b))
    ref_pol_b, ref_val_b = reference_forward(x_big, packed)
    assert pol_b.shape == (300, action_space_size)
    assert val_b.shape == (1,)
    assert jnp.allclose(pol_b, ref_pol_b, atol=1e-3, rtol=1e-3)
    assert jnp.allclose(val_b, ref_val_b, atol=1e-3, rtol=1e-3)

    print("KERNEL_OK")
</pallas_src>

<mosaic_0001>
module attributes {stable_mosaic.version = 11 : i64} {
  func.func @_scene_kernel(%arg0: i32, %arg1: memref<8x512xbf16, #tpu.memory_space<vmem>>, %arg2: memref<512x512xbf16, #tpu.memory_space<vmem>>, %arg3: memref<512x128xbf16, #tpu.memory_space<vmem>>, %arg4: memref<2x512xf32, #tpu.memory_space<vmem>>, %arg5: memref<8x128xf32, #tpu.memory_space<vmem>>) attributes {dimension_semantics = [#tpu.dimension_semantics<parallel>], iteration_bounds = array<i64: 1>, scalar_prefetch = 0 : i64, scratch_operands = 0 : i64, tpu.core_type = #tpu.core_type<tc>, window_params = [{transform_indices = @transform_0, window_bounds = array<i64: 8, 512>}, {pipeline_mode = #tpu.pipeline_mode<synchronous>, transform_indices = @transform_1, window_bounds = array<i64: 512, 512>}, {pipeline_mode = #tpu.pipeline_mode<synchronous>, transform_indices = @transform_2, window_bounds = array<i64: 512, 128>}, {pipeline_mode = #tpu.pipeline_mode<synchronous>, transform_indices = @transform_3, window_bounds = array<i64: 2, 512>}, {transform_indices = @transform_4, window_bounds = array<i64: 8, 128>}]} {
    %c0 = arith.constant 0 : index
    %c0_0 = arith.constant 0 : index
    %0 = vector.load %arg1[%c0, %c0_0] : memref<8x512xbf16, #tpu.memory_space<vmem>>, vector<8x512xbf16>
    %c0_1 = arith.constant 0 : index
    %c0_2 = arith.constant 0 : index
    %1 = vector.load %arg2[%c0_1, %c0_2] : memref<512x512xbf16, #tpu.memory_space<vmem>>, vector<512x512xbf16>
    %cst = arith.constant dense<0.000000e+00> : vector<8x512xf32>
    %2 = tpu.matmul %0, %1, %cst {dimension_numbers = #tpu.dot_dimension_numbers<[1], [0], [0], [1], [0, 0, 1, 1], [], []>} : vector<8x512xbf16>, vector<512x512xbf16>, vector<8x512xf32> -> vector<8x512xf32>
    %c0_3 = arith.constant 0 : index
    %c0_4 = arith.constant 0 : index
    %3 = vector.load %arg4[%c0_3, %c0_4] : memref<2x512xf32, #tpu.memory_space<vmem>>, vector<1x512xf32>
    %4 = vector.broadcast %3 : vector<1x512xf32> to vector<8x512xf32>
    %5 = arith.addf %2, %4 : vector<8x512xf32>
    %cst_5 = arith.constant 0.000000e+00 : f32
    %6 = vector.broadcast %cst_5 : f32 to vector<8x512xf32>
    %7 = arith.maximumf %5, %6 : vector<8x512xf32>
    %8 = arith.truncf %7 : vector<8x512xf32> to vector<8x512xbf16>
    %c0_6 = arith.constant 0 : index
    %c0_7 = arith.constant 0 : index
    %9 = vector.load %arg3[%c0_6, %c0_7] : memref<512x128xbf16, #tpu.memory_space<vmem>>, vector<512x128xbf16>
    %cst_8 = arith.constant dense<0.000000e+00> : vector<8x128xf32>
    %10 = tpu.matmul %8, %9, %cst_8 {dimension_numbers = #tpu.dot_dimension_numbers<[1], [0], [0], [1], [0, 0, 1, 1], [], []>} : vector<8x512xbf16>, vector<512x128xbf16>, vector<8x128xf32> -> vector<8x128xf32>
    %c1 = arith.constant 1 : index
    %c0_9 = arith.constant 0 : index
    %11 = vector.load %arg4[%c1, %c0_9] : memref<2x512xf32, #tpu.memory_space<vmem>>, vector<1x128xf32>
    %12 = vector.broadcast %11 : vector<1x128xf32> to vector<8x128xf32>
    %13 = arith.addf %10, %12 : vector<8x128xf32>
    %c0_10 = arith.constant 0 : index
    %c0_11 = arith.constant 0 : index
    %14 = vector.load %arg5[%c0_10, %c0_11] : memref<8x128xf32, #tpu.memory_space<vmem>>, vector<8x128xf32>
    tpu.vector_store %arg5[%c0_10, %c0_11], %13 {strides = array<i32>} : memref<8x128xf32, #tpu.memory_space<vmem>>, vector<8x128xf32>,
    return
  }
  func.func @transform_0(%arg0: i32) -> (i32, i32) {
    %c0_i32 = arith.constant 0 : i32
    %c0_i32_0 = arith.constant 0 : i32
    return %arg0, %c0_i32 : i32, i32
  }
  func.func @transform_1(%arg0: i32) -> (i32, i32) {
    %c0_i32 = arith.constant 0 : i32
    %c0_i32_0 = arith.constant 0 : i32
    %c0_i32_1 = arith.constant 0 : i32
    return %c0_i32, %c0_i32_0 : i32, i32
  }
  func.func @transform_2(%arg0: i32) -> (i32, i32) {
    %c0_i32 = arith.constant 0 : i32
    %c0_i32_0 = arith.constant 0 : i32
    %c0_i32_1 = arith.constant 0 : i32
    return %c0_i32, %c0_i32_0 : i32, i32
  }
  func.func @transform_3(%arg0: i32) -> (i32, i32) {
    %c0_i32 = arith.constant 0 : i32
    %c0_i32_0 = arith.constant 0 : i32
    %c0_i32_1 = arith.constant 0 : i32
    return %c0_i32, %c0_i32_0 : i32, i32
  }
  func.func @transform_4(%arg0: i32) -> (i32, i32) {
    %c0_i32 = arith.constant 0 : i32
    %c0_i32_0 = arith.constant 0 : i32
    return %arg0, %c0_i32 : i32, i32
  }
}

</mosaic_0001>

<bundles_post_ra>
// kernel: tpu_custom_call.1
= control target key start
LH: loop header
LB: loop body
LE: loop exit
PB: predicated region body
PF: predicated region fallthrough
CT: control target
= control target key end

     0   :  { %9 = vsyncpa [#allocation3], 0  ;;  %s2038_s0 = inlined_call_operand.hbm [shape: bf16[8,512], index: 0, kind: input, shape index: {}]   ;;  %s2039_s1 = inlined_call_operand.hbm [shape: bf16[512,512], index: 1, kind: input, shape index: {}]   ;;  %s2040_s2 = inlined_call_operand.hbm [shape: bf16[512,128], index: 2, kind: input, shape index: {}]   ;;  %s2041_s3 = inlined_call_operand.vmem [shape: f32[2,512], index: 3, kind: input, shape index: {}]   ;;  %s2042_s4 = inlined_call_operand.hbm [shape: f32[8,128], index: 4, kind: output, shape index: {}]  }
   0x1   :  { %10 = vsyncpa [#allocation6], 0 }
   0x2   :  { %11 = vsyncpa [#allocation4], 0  ;;  %s1945_s15 = smov [#allocation5]   ;;  %s1851_s19 = scalar_lea.hbm %s2039_s1, 16384 }
   0x3   :  { %s27_s16 = sshll.u32 %s1945_s15, 4  ;;  %p1852_p0 = scmp.ne.s32.totalorder %s2039_s1, %s1851_s19  ;;  %s28_s16 = int_to_ptr.vmem [resolvable:$true] %s27_s16 }
   0x4   :  { %p1855_p1 = scmp.lt.u32.totalorder %s1851_s19, %s2039_s1 }
   0x6   :  { %p1857_p2 = pnand %p1855_p1, %p1852_p0 }
   0x8   :  { %1860 = shalt.err (!%p1857_p2)
}
   0x9   :  { %s1861_s24 = scalar_lea.vmem %s28_s16, 16384  ;;  %p1866_p4 = scmp.lt.s32.totalorder %s28_s16, %s28_s16 }
   0xa   :  { %p1862_p3 = scmp.ne.s32.totalorder %s28_s16, %s1861_s24  ;;  %p1867_p5 = scmp.lt.s32.totalorder %s1861_s24, %s1861_s24 }
   0xc   :  { %p1868_p6 = por %p1867_p5, %p1866_p4 }
   0xe   :  { %p1869_p7 = pnand %p1868_p6, %p1862_p3 }
  0x10   :  { %1872 = shalt.err (!%p1869_p7)
}
  0x11   :  { %s1946_s25 = smov 256   ;;  %s1947_s26 = smov 16  }
  0x12   :  { %33 = dma.hbm_to_vmem [thread:$0]  %s2039_s1, 16384, %s28_s16, [#allocation6], %s1946_s25, %s1946_s25, %s1947_s26  }
  0x13   :  { %s1948_s29 = smov [#allocation2]   ;;  %s1949_s5 = smov [#allocation7]  }
  0x14   :  { %s18_s30 = sshll.u32 %s1948_s29, 4  ;;  %s39_s6 = sshll.u32 %s1949_s5, 4  ;;  %s19_s30 = int_to_ptr.vmem [resolvable:$true] %s18_s30  ;;  %s40_s6 = int_to_ptr.vmem [resolvable:$true] %s39_s6 }
  0x15   :  { %s1873_s9 = scalar_lea.hbm %s2038_s0, 256 }
  0x16   :  { %p1874_p8 = scmp.ne.s32.totalorder %s2038_s0, %s1873_s9  ;;  %p1877_p9 = scmp.lt.u32.totalorder %s1873_s9, %s2038_s0 }
  0x18   :  { %p1879_p10 = pnand %p1877_p9, %p1874_p8 }
  0x1a   :  { %1882 = shalt.err (!%p1879_p10)
}
  0x1b   :  { %s1883_s1 = scalar_lea.vmem %s19_s30, 256  ;;  %p1888_p12 = scmp.lt.s32.totalorder %s19_s30, %s19_s30 }
  0x1c   :  { %p1884_p11 = scmp.ne.s32.totalorder %s19_s30, %s1883_s1  ;;  %p1889_p13 = scmp.lt.s32.totalorder %s1883_s1, %s1883_s1 }
  0x1e   :  { %p1890_p0 = por %p1889_p13, %p1888_p12 }
  0x20   :  { %p1891_p1 = pnand %p1890_p0, %p1884_p11 }
  0x22   :  { %1894 = shalt.err (!%p1891_p1)
}
  0x23   :  { %21 = dma.hbm_to_vmem [thread:$0]  %s2038_s0, 256, %s19_s30, [#allocation3]  }
  0x24   :  { %s1895_s18 = scalar_lea.hbm %s2040_s2, 4096 }
  0x25   :  { %p1896_p2 = scmp.ne.s32.totalorder %s2040_s2, %s1895_s18  ;;  %p1899_p3 = scmp.lt.u32.totalorder %s1895_s18, %s2040_s2 }
  0x27   :  { %p1901_p4 = pnand %p1899_p3, %p1896_p2 }
  0x29   :  { %1904 = shalt.err (!%p1901_p4)
}
  0x2a   :  { %s1905_s23 = scalar_lea.vmem %s40_s6, 4096  ;;  %p1910_p6 = scmp.lt.s32.totalorder %s40_s6, %s40_s6 }
  0x2b   :  { %p1906_p5 = scmp.ne.s32.totalorder %s40_s6, %s1905_s23  ;;  %p1911_p7 = scmp.lt.s32.totalorder %s1905_s23, %s1905_s23 }
  0x2d   :  { %p1912_p8 = por %p1911_p7, %p1910_p6 }
  0x2f   :  { %p1913_p9 = pnand %p1912_p8, %p1906_p5 }
  0x31   :  { %1916 = shalt.err (!%p1913_p9)
}
  0x32   :  { %s1950_s0 = smov 64   ;;  %s1951_s24 = smov 4  }
  0x33   :  { %45 = dma.hbm_to_vmem [thread:$0]  %s2040_s2, 4096, %s40_s6, [#allocation6], %s1950_s0, %s1950_s0, %s1951_s24  }
  0x34   :  { %1939 = dma.done.wait [#allocation3], 256  }
  0x35   :  { %1940 = vsyncadd [#allocation3], 4294967040 }
  0x36   :  { %1941 = dma.done.wait [#allocation6], 20480  }
  0x37   :  { %1942 = vsyncadd [#allocation6], 4294946816  ;;  %v1623_v0 = vld [vmem:[#allocation5 + $0x4] ss:$16 sps:$4 sm:$0xff]   ;;  %v1625_v1 = vld [vmem:[#allocation5 + $0xc] ss:$16 sps:$4 sm:$0xff]  }
  0x38   :  { %864 = vmatprep.subr.bf16.mxu0 %v1623_v0  ;;  %v1627_v2 = vld [vmem:[#allocation5] ss:$16 sps:$4 sm:$0xff]   ;;  %v1628_v3 = vld [vmem:[#allocation5 + $0x8] ss:$16 sps:$4 sm:$0xff]   ;;  %946 = vmatprep.subr.bf16.mxu1 %v1625_v1  ;;  %v1629_v4 = vld [vmem:[#allocation5 + $0x24] ss:$16 sps:$4 sm:$0xff]  }
  0x39   :  { %865 = vmatpush1.bf16.msra.mxu0 %v1627_v2  ;;  %947 = vmatpush1.bf16.msra.mxu1 %v1628_v3  ;;  %v1631_v5 = vld [vmem:[#allocation5 + $0x2c] ss:$16 sps:$4 sm:$0xff]   ;;  %v1633_v6 = vld [vmem:[#allocation5 + $0x20] ss:$16 sps:$4 sm:$0xff]   ;;  %v1634_v7 = vld [vmem:[#allocation5 + $0x28] ss:$16 sps:$4 sm:$0xff]  }
  0x3a   :  { %866 = vmatprep.subr.bf16.mxu0 %v1629_v4  ;;  %948 = vmatprep.subr.bf16.mxu1 %v1631_v5  ;;  %v1635_v8 = vld [vmem:[#allocation5 + $0x44] ss:$16 sps:$4 sm:$0xff]   ;;  %v1637_v9 = vld [vmem:[#allocation5 + $0x4c] ss:$16 sps:$4 sm:$0xff]   ;;  %v1639_v10 = vld [vmem:[#allocation5 + $0x40] ss:$16 sps:$4 sm:$0xff]  }
  0x3b   :  { %v1640_v11 = vld [vmem:[#allocation5 + $0x48] ss:$16 sps:$4 sm:$0xff]   ;;  %v1641_v12 = vld [vmem:[#allocation5 + $0x64] ss:$16 sps:$4 sm:$0xff]   ;;  %v1643_v13 = vld [vmem:[#allocation5 + $0x6c] ss:$16 sps:$4 sm:$0xff]  }
  0x3c   :  { %v1645_v14 = vld [vmem:[#allocation5 + $0x60] ss:$16 sps:$4 sm:$0xff]   ;;  %v1646_v15 = vld [vmem:[#allocation5 + $0x68] ss:$16 sps:$4 sm:$0xff]   ;;  %v1647_v16 = vld [vmem:[#allocation5 + $0x84] ss:$16 sps:$4 sm:$0xff]  }
  0x3d   :  { %867 = vmatpush1.bf16.msra.mxu0 %v1633_v6  ;;  %949 = vmatpush1.bf16.msra.mxu1 %v1634_v7  ;;  %v1649_v17 = vld [vmem:[#allocation5 + $0x8c] ss:$16 sps:$4 sm:$0xff]   ;;  %v1651_v18 = vld [vmem:[#allocation5 + $0x80] ss:$16 sps:$4 sm:$0xff]   ;;  %v1652_v19 = vld [vmem:[#allocation5 + $0x88] ss:$16 sps:$4 sm:$0xff]  }
  0x3e   :  { %868 = vmatprep.subr.bf16.mxu0 %v1635_v8  ;;  %950 = vmatprep.subr.bf16.mxu1 %v1637_v9  ;;  %v1653_v20 = vld [vmem:[#allocation5 + $0xa4] ss:$16 sps:$4 sm:$0xff]   ;;  %v1655_v21 = vld [vmem:[#allocation5 + $0xac] ss:$16 sps:$4 sm:$0xff]   ;;  %v1657_v22 = vld [vmem:[#allocation5 + $0xa0] ss:$16 sps:$4 sm:$0xff]  }
  0x3f   :  { %v1658_v23 = vld [vmem:[#allocation5 + $0xa8] ss:$16 sps:$4 sm:$0xff]   ;;  %v1659_v24 = vld [vmem:[#allocation5 + $0xc4] ss:$16 sps:$4 sm:$0xff]   ;;  %v1661_v25 = vld [vmem:[#allocation5 + $0xcc] ss:$16 sps:$4 sm:$0xff]  }
  0x40   :  { %v1663_v26 = vld [vmem:[#allocation5 + $0xc0] ss:$16 sps:$4 sm:$0xff]   ;;  %v1664_v27 = vld [vmem:[#allocation5 + $0xc8] ss:$16 sps:$4 sm:$0xff]   ;;  %v1665_v28 = vld [vmem:[#allocation5 + $0xe4] ss:$16 sps:$4 sm:$0xff]  }
  0x41   :  { %869 = vmatpush1.bf16.msra.mxu0 %v1639_v10  ;;  %951 = vmatpush1.bf16.msra.mxu1 %v1640_v11  ;;  %v1667_v29 = vld [vmem:[#allocation5 + $0xec] ss:$16 sps:$4 sm:$0xff]   ;;  %v1669_v30 = vld [vmem:[#allocation5 + $0xe0] ss:$16 sps:$4 sm:$0xff]   ;;  %v1670_v31 = vld [vmem:[#allocation5 + $0xe8] ss:$16 sps:$4 sm:$0xff]  }
  0x42   :  { %870 = vmatprep.subr.bf16.mxu0 %v1641_v12  ;;  %952 = vmatprep.subr.bf16.mxu1 %v1643_v13  ;;  %v1671_v32 = vld [vmem:[#allocation5 + $0x104] ss:$16 sps:$4 sm:$0xff]   ;;  %v1673_v33 = vld [vmem:[#allocation5 + $0x10c] ss:$16 sps:$4 sm:$0xff]   ;;  %v1675_v34 = vld [vmem:[#allocation5 + $0x100] ss:$16 sps:$4 sm:$0xff]  }
  0x43   :  { %v1676_v35 = vld [vmem:[#allocation5 + $0x108] ss:$16 sps:$4 sm:$0xff]   ;;  %v1677_v36 = vld [vmem:[#allocation5 + $0x124] ss:$16 sps:$4 sm:$0xff]   ;;  %v1679_v37 = vld [vmem:[#allocation5 + $0x12c] ss:$16 sps:$4 sm:$0xff]  }
  0x44   :  { %v1681_v38 = vld [vmem:[#allocation5 + $0x120] ss:$16 sps:$4 sm:$0xff]   ;;  %v1682_v39 = vld [vmem:[#allocation5 + $0x128] ss:$16 sps:$4 sm:$0xff]   ;;  %v1683_v40 = vld [vmem:[#allocation5 + $0x144] ss:$16 sps:$4 sm:$0xff]  }
  0x45   :  { %871 = vmatpush1.bf16.msra.mxu0 %v1645_v14  ;;  %953 = vmatpush1.bf16.msra.mxu1 %v1646_v15  ;;  %v1685_v41 = vld [vmem:[#allocation5 + $0x14c] ss:$16 sps:$4 sm:$0xff]   ;;  %v1687_v42 = vld [vmem:[#allocation5 + $0x140] ss:$16 sps:$4 sm:$0xff]   ;;  %v1688_v43 = vld [vmem:[#allocation5 + $0x148] ss:$16 sps:$4 sm:$0xff]  }
  0x46   :  { %872 = vmatprep.subr.bf16.mxu0 %v1647_v16  ;;  %954 = vmatprep.subr.bf16.mxu1 %v1649_v17  ;;  %v1689_v44 = vld [vmem:[#allocation5 + $0x164] ss:$16 sps:$4 sm:$0xff]   ;;  %v1691_v45 = vld [vmem:[#allocation5 + $0x16c] ss:$16 sps:$4 sm:$0xff]   ;;  %v1693_v47 = vld [vmem:[#allocation5 + $0x160] ss:$16 sps:$4 sm:$0xff]  }
  0x47   :  { %v58_v46 = vld [vmem:[#allocation2] sm:$0xff]  ;;  %v1694_v49 = vld [vmem:[#allocation5 + $0x168] ss:$16 sps:$4 sm:$0xff]   ;;  %v1697_v51 = vld [vmem:[#allocation5 + $0x18c] ss:$16 sps:$4 sm:$0xff]   ;;  %s1952_s30 = smov [#allocation8]  }
  0x48   :  { %v1395_v48 = vcombine.high %v58_v46, %v58_v46  ;;  %v1695_v50 = vld [vmem:[#allocation5 + $0x184] ss:$16 sps:$4 sm:$0xff]   ;;  %v1699_v52 = vld [vmem:[#allocation5 + $0x180] ss:$16 sps:$4 sm:$0xff]   ;;  %v1700_v53 = vld [vmem:[#allocation5 + $0x188] ss:$16 sps:$4 sm:$0xff]   ;;  %v1394_v4 = vcombine.low %v58_v46, %v58_v46 }
  0x49   :  { %873 = vmatpush1.bf16.msra.mxu0 %v1651_v18  ;;  %955 = vmatpush1.bf16.msra.mxu1 %v1652_v19  ;;  %v1701_v54 = vld [vmem:[#allocation5 + $0x1a4] ss:$16 sps:$4 sm:$0xff]   ;;  %v1703_v55 = vld [vmem:[#allocation5 + $0x1ac] ss:$16 sps:$4 sm:$0xff]   ;;  %v1705_v56 = vld [vmem:[#allocation5 + $0x1a0] ss:$16 sps:$4 sm:$0xff]  }
  0x4a   :  { %874 = vmatprep.subr.bf16.mxu0 %v1653_v20  ;;  %956 = vmatprep.subr.bf16.mxu1 %v1655_v21  ;;  %v1706_v57 = vld [vmem:[#allocation5 + $0x1a8] ss:$16 sps:$4 sm:$0xff]   ;;  %v1707_v58 = vld [vmem:[#allocation5 + $0x1c4] ss:$16 sps:$4 sm:$0xff]   ;;  %v1709_v59 = vld [vmem:[#allocation5 + $0x1cc] ss:$16 sps:$4 sm:$0xff]  }
  0x4b   :  { %896 = vmatprep.mubr.bf16.mxu0 %v1395_v48  ;;  %978 = vmatprep.mubr.bf16.mxu1 %v1395_v48  ;;  %v1711_v60 = vld [vmem:[#allocation5 + $0x1c0] ss:$16 sps:$4 sm:$0xff]   ;;  %v1712_v61 = vld [vmem:[#allocation5 + $0x1c8] ss:$16 sps:$4 sm:$0xff]   ;;  %v1713_v62 = vld [vmem:[#allocation5 + $0x1e4] ss:$16 sps:$4 sm:$0xff]  }
  0x4c   :  { %v1715_v63 = vld [vmem:[#allocation5 + $0x1ec] ss:$16 sps:$4 sm:$0xff]   ;;  %v1717_v0 = vld [vmem:[#allocation5 + $0x1e0] ss:$16 sps:$4 sm:$0xff]   ;;  %v1718_v1 = vld [vmem:[#allocation5 + $0x1e8] ss:$16 sps:$4 sm:$0xff]  }
  0x4d   :  { %875 = vmatpush1.bf16.msra.mxu0 %v1657_v22  ;;  %957 = vmatpush1.bf16.msra.mxu1 %v1658_v23  ;;  %v1723_v2 = vld [vmem:[#allocation5 + $0x204] ss:$16 sps:$4 sm:$0xff]   ;;  %v1726_v3 = vld [vmem:[#allocation5 + $0x20c] ss:$16 sps:$4 sm:$0xff]   ;;  %v1721_v5 = vld [vmem:[#allocation5 + $0x200] ss:$16 sps:$4 sm:$0xff]  }
  0x4e   :  { %876 = vmatprep.subr.bf16.mxu0 %v1659_v24  ;;  %958 = vmatprep.subr.bf16.mxu1 %v1661_v25  ;;  %v1724_v6 = vld [vmem:[#allocation5 + $0x208] ss:$16 sps:$4 sm:$0xff]   ;;  %v1729_v7 = vld [vmem:[#allocation5 + $0x224] ss:$16 sps:$4 sm:$0xff]   ;;  %v1732_v8 = vld [vmem:[#allocation5 + $0x22c] ss:$16 sps:$4 sm:$0xff]  }
  0x4f   :  { %v1727_v9 = vld [vmem:[#allocation5 + $0x220] ss:$16 sps:$4 sm:$0xff]   ;;  %v1730_v10 = vld [vmem:[#allocation5 + $0x228] ss:$16 sps:$4 sm:$0xff]   ;;  %v1735_v11 = vld [vmem:[#allocation5 + $0x244] ss:$16 sps:$4 sm:$0xff]  }
  0x50   :  { %v1738_v12 = vld [vmem:[#allocation5 + $0x24c] ss:$16 sps:$4 sm:$0xff]   ;;  %v1733_v13 = vld [vmem:[#allocation5 + $0x240] ss:$16 sps:$4 sm:$0xff]   ;;  %v1736_v14 = vld [vmem:[#allocation5 + $0x248] ss:$16 sps:$4 sm:$0xff]  }
  0x51   :  { %877 = vmatpush1.bf16.msra.mxu0 %v1663_v26  ;;  %959 = vmatpush1.bf16.msra.mxu1 %v1664_v27  ;;  %v1741_v15 = vld [vmem:[#allocation5 + $0x264] ss:$16 sps:$4 sm:$0xff]   ;;  %v1744_v16 = vld [vmem:[#allocation5 + $0x26c] ss:$16 sps:$4 sm:$0xff]   ;;  %v1739_v17 = vld [vmem:[#allocation5 + $0x260] ss:$16 sps:$4 sm:$0xff]  }
  0x52   :  { %878 = vmatprep.subr.bf16.mxu0 %v1665_v28  ;;  %960 = vmatprep.subr.bf16.mxu1 %v1667_v29  ;;  %v1742_v18 = vld [vmem:[#allocation5 + $0x268] ss:$16 sps:$4 sm:$0xff]   ;;  %v1747_v19 = vld [vmem:[#allocation5 + $0x284] ss:$16 sps:$4 sm:$0xff]   ;;  %v1750_v20 = vld [vmem:[#allocation5 + $0x28c] ss:$16 sps:$4 sm:$0xff]  }
  0x53   :  { %v1745_v21 = vld [vmem:[#allocation5 + $0x280] ss:$16 sps:$4 sm:$0xff]   ;;  %v1748_v22 = vld [vmem:[#allocation5 + $0x288] ss:$16 sps:$4 sm:$0xff]   ;;  %v1753_v23 = vld [vmem:[#allocation5 + $0x2a4] ss:$16 sps:$4 sm:$0xff]  }
  0x54   :  { %v1756_v24 = vld [vmem:[#allocation5 + $0x2ac] ss:$16 sps:$4 sm:$0xff]   ;;  %v1751_v25 = vld [vmem:[#allocation5 + $0x2a0] ss:$16 sps:$4 sm:$0xff]   ;;  %v1754_v26 = vld [vmem:[#allocation5 + $0x2a8] ss:$16 sps:$4 sm:$0xff]  }
  0x55   :  { %879 = vmatpush1.bf16.msra.mxu0 %v1669_v30  ;;  %961 = vmatpush1.bf16.msra.mxu1 %v1670_v31  ;;  %v1759_v27 = vld [vmem:[#allocation5 + $0x2c4] ss:$16 sps:$4 sm:$0xff]   ;;  %v1762_v28 = vld [vmem:[#allocation5 + $0x2cc] ss:$16 sps:$4 sm:$0xff]   ;;  %v1757_v30 = vld [vmem:[#allocation5 + $0x2c0] ss:$16 sps:$4 sm:$0xff]  }
  0x56   :  { %880 = vmatprep.subr.bf16.mxu0 %v1671_v32  ;;  %962 = vmatprep.subr.bf16.mxu1 %v1673_v33  ;;  %v2014_v29 = vld [vmem:[#allocation2 + $0x8] sm:$0xff]  ;;  %v1765_v33 = vld [vmem:[#allocation5 + $0x2e4] ss:$16 sps:$4 sm:$0xff]   ;;  %s1384_s5 = sshll.u32 %s1952_s30, 4  ;;  %s1385_s5 = int_to_ptr.vmem [resolvable:$true] %s1384_s5 }
  0x57   :  { %v1397_v31 = vcombine.high %v2014_v29, %v2014_v29  ;;  %v1760_v32 = vld [vmem:[#allocation5 + $0x2c8] ss:$16 sps:$4 sm:$0xff]   ;;  %v1786_v46 = vld [vmem:[#allocation5 + $0x34c] ss:$16 sps:$4 sm:$0xff]   ;;  %s1917_s6 = scalar_lea.vmem %s1385_s5, 128  ;;  %p1922_p11 = scmp.lt.s32.totalorder %s1385_s5, %s1385_s5 }
  0x58   :  { %v1784_v48 = vld [vmem:[#allocation5 + $0x348] ss:$16 sps:$4 sm:$0xff]   ;;  %p1918_p10 = scmp.ne.s32.totalorder %s1385_s5, %s1917_s6  ;;  %p1923_p12 = scmp.lt.s32.totalorder %s1917_s6, %s1917_s6 }
  0x59   :  { %881 = vmatpush1.bf16.msra.mxu0 %v1675_v34  ;;  %963 = vmatpush1.bf16.msra.mxu1 %v1676_v35  ;;  %v1768_v34 = vld [vmem:[#allocation5 + $0x2ec] ss:$16 sps:$4 sm:$0xff]   ;;  %v1763_v35 = vld [vmem:[#allocation5 + $0x2e0] ss:$16 sps:$4 sm:$0xff]  }
  0x5a   :  { %882 = vmatprep.subr.bf16.mxu0 %v1677_v36  ;;  %964 = vmatprep.subr.bf16.mxu1 %v1679_v37  ;;  %v1766_v36 = vld [vmem:[#allocation5 + $0x2e8] ss:$16 sps:$4 sm:$0xff]   ;;  %v1771_v37 = vld [vmem:[#allocation5 + $0x304] ss:$16 sps:$4 sm:$0xff]   ;;  %p1924_p13 = por %p1923_p12, %p1922_p11 }
  0x5c   :  { %p1925_p0 = pnand %p1924_p13, %p1918_p10 }
  0x5d   :  { %883 = vmatpush1.bf16.msra.mxu0 %v1681_v38  ;;  %965 = vmatpush1.bf16.msra.mxu1 %v1682_v39  ;;  %v1774_v38 = vld [vmem:[#allocation5 + $0x30c] ss:$16 sps:$4 sm:$0xff]   ;;  %v1769_v39 = vld [vmem:[#allocation5 + $0x300] ss:$16 sps:$4 sm:$0xff]  }
  0x5e   :  { %884 = vmatprep.subr.bf16.mxu0 %v1683_v40  ;;  %966 = vmatprep.subr.bf16.mxu1 %v1685_v41  ;;  %v1772_v40 = vld [vmem:[#allocation5 + $0x308] ss:$16 sps:$4 sm:$0xff]   ;;  %v1777_v41 = vld [vmem:[#allocation5 + $0x324] ss:$16 sps:$4 sm:$0xff]  }
  0x61   :  { %885 = vmatpush1.bf16.msra.mxu0 %v1687_v42  ;;  %967 = vmatpush1.bf16.msra.mxu1 %v1688_v43  ;;  %v1780_v42 = vld [vmem:[#allocation5 + $0x32c] ss:$16 sps:$4 sm:$0xff]   ;;  %v1775_v43 = vld [vmem:[#allocation5 + $0x320] ss:$16 sps:$4 sm:$0xff]  }
  0x62   :  { %886 = vmatprep.subr.bf16.mxu0 %v1689_v44  ;;  %968 = vmatprep.subr.bf16.mxu1 %v1691_v45  ;;  %v1778_v44 = vld [vmem:[#allocation5 + $0x328] ss:$16 sps:$4 sm:$0xff]   ;;  %v1783_v45 = vld [vmem:[#allocation5 + $0x344] ss:$16 sps:$4 sm:$0xff]  }
  0x65   :  { %887 = vmatpush1.bf16.msra.mxu0 %v1693_v47  ;;  %969 = vmatpush1.bf16.msra.mxu1 %v1694_v49  ;;  %v1781_v47 = vld [vmem:[#allocation5 + $0x340] ss:$16 sps:$4 sm:$0xff]   ;;  %v1789_v49 = vld [vmem:[#allocation5 + $0x364] ss:$16 sps:$4 sm:$0xff]  }
  0x66   :  { %888 = vmatprep.subr.bf16.mxu0 %v1695_v50  ;;  %970 = vmatprep.subr.bf16.mxu1 %v1697_v51  ;;  %v1792_v50 = vld [vmem:[#allocation5 + $0x36c] ss:$16 sps:$4 sm:$0xff]   ;;  %v1787_v51 = vld [vmem:[#allocation5 + $0x360] ss:$16 sps:$4 sm:$0xff]  }
  0x69   :  { %889 = vmatpush1.bf16.msra.mxu0 %v1699_v52  ;;  %971 = vmatpush1.bf16.msra.mxu1 %v1700_v53  ;;  %v1790_v52 = vld [vmem:[#allocation5 + $0x368] ss:$16 sps:$4 sm:$0xff]   ;;  %v1795_v53 = vld [vmem:[#allocation5 + $0x384] ss:$16 sps:$4 sm:$0xff]  }
  0x6a   :  { %890 = vmatprep.subr.bf16.mxu0 %v1701_v54  ;;  %972 = vmatprep.subr.bf16.mxu1 %v1703_v55  ;;  %v1798_v54 = vld [vmem:[#allocation5 + $0x38c] ss:$16 sps:$4 sm:$0xff]   ;;  %v1793_v55 = vld [vmem:[#allocation5 + $0x380] ss:$16 sps:$4 sm:$0xff]  }
  0x6d   :  { %891 = vmatpush1.bf16.msra.mxu0 %v1705_v56  ;;  %973 = vmatpush1.bf16.msra.mxu1 %v1706_v57  ;;  %v1796_v56 = vld [vmem:[#allocation5 + $0x388] ss:$16 sps:$4 sm:$0xff]   ;;  %v1801_v57 = vld [vmem:[#allocation5 + $0x3a4] ss:$16 sps:$4 sm:$0xff]  }
  0x6e   :  { %892 = vmatprep.subr.bf16.mxu0 %v1707_v58  ;;  %974 = vmatprep.subr.bf16.mxu1 %v1709_v59  ;;  %v1804_v58 = vld [vmem:[#allocation5 + $0x3ac] ss:$16 sps:$4 sm:$0xff]   ;;  %v1799_v59 = vld [vmem:[#allocation5 + $0x3a0] ss:$16 sps:$4 sm:$0xff]  }
  0x71   :  { %893 = vmatpush1.bf16.msra.mxu0 %v1711_v60  ;;  %975 = vmatpush1.bf16.msra.mxu1 %v1712_v61  ;;  %v1802_v60 = vld [vmem:[#allocation5 + $0x3a8] ss:$16 sps:$4 sm:$0xff]   ;;  %v1807_v61 = vld [vmem:[#allocation5 + $0x3c4] ss:$16 sps:$4 sm:$0xff]  }
  0x72   :  { %894 = vmatprep.subr.bf16.mxu0 %v1713_v62  ;;  %976 = vmatprep.subr.bf16.mxu1 %v1715_v63  ;;  %v1810_v62 = vld [vmem:[#allocation5 + $0x3cc] ss:$16 sps:$4 sm:$0xff]   ;;  %v1805_v63 = vld [vmem:[#allocation5 + $0x3c0] ss:$16 sps:$4 sm:$0xff]  }
  0x75   :  { %895 = vmatpush1.bf16.msra.mxu0 %v1717_v0  ;;  %977 = vmatpush1.bf16.msra.mxu1 %v1718_v1  ;;  %v1808_v0 = vld [vmem:[#allocation5 + $0x3c8] ss:$16 sps:$4 sm:$0xff]   ;;  %v1813_v1 = vld [vmem:[#allocation5 + $0x3e4] ss:$16 sps:$4 sm:$0xff]  }
  0x76   :  { %905 = vmatprep.subr.bf16.mxu0 %v1723_v2  ;;  %987 = vmatprep.subr.bf16.mxu1 %v1726_v3  ;;  %v1816_v2 = vld [vmem:[#allocation5 + $0x3ec] ss:$16 sps:$4 sm:$0xff]   ;;  %v1811_v3 = vld [vmem:[#allocation5 + $0x3e0] ss:$16 sps:$4 sm:$0xff]  }
  0x78   :  { %897 = vmatmul.mubr.bf16.vlgmr.msra.gmra.mrb[0].mxu0 %v1394_v4  ;;  %979 = vmatmul.mubr.bf16.vlgmr.msra.gmra.mrb[0].mxu1 %v1394_v4  ;;  %v1814_v4 = vld [vmem:[#allocation5 + $0x3e8] ss:$16 sps:$4 sm:$0xff]  }
  0x79   :  { %906 = vmatpush1.bf16.msra.mxu0 %v1721_v5  ;;  %988 = vmatpush1.bf16.msra.mxu1 %v1724_v6  ;;  %v1819_v5 = vld [vmem:[#allocation7 + $0x40] sm:$0xff]  }
  0x7a   :  { %907 = vmatprep.subr.bf16.mxu0 %v1729_v7  ;;  %989 = vmatprep.subr.bf16.mxu1 %v1732_v8  ;;  %v1820_v6 = vld [vmem:[#allocation7 + $0xc0] sm:$0xff]   ;;  %v1396_v7 = vcombine.low %v2014_v29, %v2014_v29  ;;  %v1842_v29 = vld [vmem:[#allocation7 + $0xa8] sm:$0xff]  }
  0x7b   :  { %937 = vmatprep.mubr.bf16.mxu0 %v1397_v31  ;;  %1019 = vmatprep.mubr.bf16.mxu1 %v1397_v31  ;;  %v1821_v8 = vld [vmem:[#allocation7] sm:$0xff]   ;;  %v1844_v31 = vld [vmem:[#allocation7 + $0xf0] sm:$0xff]  }
  0x7d   :  { %908 = vmatpush1.bf16.msra.mxu0 %v1727_v9  ;;  %990 = vmatpush1.bf16.msra.mxu1 %v1730_v10  ;;  %v1822_v9 = vld [vmem:[#allocation7 + $0x80] sm:$0xff]   ;;  %v1823_v10 = vld [vmem:[#allocation7 + $0x48] sm:$0xff]  }
  0x7e   :  { %909 = vmatprep.subr.bf16.mxu0 %v1735_v11  ;;  %991 = vmatprep.subr.bf16.mxu1 %v1738_v12  ;;  %v1824_v11 = vld [vmem:[#allocation7 + $0xc8] sm:$0xff]  }
  0x7f   :  { %v1825_v12 = vld [vmem:[#allocation7 + $0x8] sm:$0xff]  }
  0x81   :  { %910 = vmatpush1.bf16.msra.mxu0 %v1733_v13  ;;  %992 = vmatpush1.bf16.msra.mxu1 %v1736_v14  ;;  %v1826_v13 = vld [vmem:[#allocation7 + $0x88] sm:$0xff]   ;;  %v1827_v14 = vld [vmem:[#allocation7 + $0x50] sm:$0xff]  }
  0x82   :  { %911 = vmatprep.subr.bf16.mxu0 %v1741_v15  ;;  %993 = vmatprep.subr.bf16.mxu1 %v1744_v16  ;;  %v1828_v15 = vld [vmem:[#allocation7 + $0xd0] sm:$0xff]  }
  0x83   :  { %v1829_v16 = vld [vmem:[#allocation7 + $0x10] sm:$0xff]  }
  0x85   :  { %912 = vmatpush1.bf16.msra.mxu0 %v1739_v17  ;;  %994 = vmatpush1.bf16.msra.mxu1 %v1742_v18  ;;  %v1830_v17 = vld [vmem:[#allocation7 + $0x90] sm:$0xff]   ;;  %v1831_v18 = vld [vmem:[#allocation7 + $0x58] sm:$0xff]  }
  0x86   :  { %913 = vmatprep.subr.bf16.mxu0 %v1747_v19  ;;  %995 = vmatprep.subr.bf16.mxu1 %v1750_v20  ;;  %v1832_v19 = vld [vmem:[#allocation7 + $0xd8] sm:$0xff]  }
  0x87   :  { %v1833_v20 = vld [vmem:[#allocation7 + $0x18] sm:$0xff]  }
  0x89   :  { %914 = vmatpush1.bf16.msra.mxu0 %v1745_v21  ;;  %996 = vmatpush1.bf16.msra.mxu1 %v1748_v22  ;;  %v1834_v21 = vld [vmem:[#allocation7 + $0x98] sm:$0xff]   ;;  %v1835_v22 = vld [vmem:[#allocation7 + $0x60] sm:$0xff]  }
  0x8a   :  { %915 = vmatprep.subr.bf16.mxu0 %v1753_v23  ;;  %997 = vmatprep.subr.bf16.mxu1 %v1756_v24  ;;  %v1836_v23 = vld [vmem:[#allocation7 + $0xe0] sm:$0xff]  }
  0x8b   :  { %v1837_v24 = vld [vmem:[#allocation7 + $0x20] sm:$0xff]  }
  0x8d   :  { %916 = vmatpush1.bf16.msra.mxu0 %v1751_v25  ;;  %998 = vmatpush1.bf16.msra.mxu1 %v1754_v26  ;;  %v1838_v25 = vld [vmem:[#allocation7 + $0xa0] sm:$0xff]   ;;  %v1839_v26 = vld [vmem:[#allocation7 + $0x68] sm:$0xff]  }
  0x8e   :  { %917 = vmatprep.subr.bf16.mxu0 %v1759_v27  ;;  %999 = vmatprep.subr.bf16.mxu1 %v1762_v28  ;;  %v1840_v27 = vld [vmem:[#allocation7 + $0xe8] sm:$0xff]  }
  0x8f   :  { %v1841_v28 = vld [vmem:[#allocation7 + $0x28] sm:$0xff]  }
  0x91   :  { %918 = vmatpush1.bf16.msra.mxu0 %v1757_v30  ;;  %1000 = vmatpush1.bf16.msra.mxu1 %v1760_v32  ;;  %v1843_v30 = vld [vmem:[#allocation7 + $0x70] sm:$0xff]  }
  0x92   :  { %919 = vmatprep.subr.bf16.mxu0 %v1765_v33  ;;  %1001 = vmatprep.subr.bf16.mxu1 %v1768_v34  ;;  %v1845_v32 = vld [vmem:[#allocation7 + $0x30] sm:$0xff]   ;;  %v1847_v34 = vld [vmem:[#allocation7 + $0x78] sm:$0xff]  }
  0x93   :  { %v1846_v33 = vld [vmem:[#allocation7 + $0xb0] sm:$0xff]  }
  0x95   :  { %920 = vmatpush1.bf16.msra.mxu0 %v1763_v35  ;;  %1002 = vmatpush1.bf16.msra.mxu1 %v1766_v36  ;;  %v1848_v35 = vld [vmem:[#allocation7 + $0xf8] sm:$0xff]  }
  0x96   :  { %921 = vmatprep.subr.bf16.mxu0 %v1771_v37  ;;  %1003 = vmatprep.subr.bf16.mxu1 %v1774_v38  ;;  %v1849_v36 = vld [vmem:[#allocation7 + $0x38] sm:$0xff]   ;;  %v190_v38 = vlaneseq }
  0x97   :  { %v1850_v37 = vld [vmem:[#allocation7 + $0xb8] sm:$0xff]  }
  0x99   :  { %922 = vmatpush1.bf16.msra.mxu0 %v1769_v39  ;;  %1004 = vmatpush1.bf16.msra.mxu1 %v1772_v40  ;;  %v191_v39 = vshrl.u32 %v190_v38, 7 }
  0x9a   :  { %923 = vmatprep.subr.bf16.mxu0 %v1777_v41  ;;  %1005 = vmatprep.subr.bf16.mxu1 %v1780_v42  ;;  %v188_v42 = vld [vmem:[%s2041_s3] ss:$2 sm:$0xf] }
  0x9b   :  { %v192_v40 = vsub.s32 0, %v191_v39  ;;  %v200_v41 = vsub.s32 2, %v191_v39 }
  0x9d   :  { %924 = vmatpush1.bf16.msra.mxu0 %v1775_v43  ;;  %1006 = vmatpush1.bf16.msra.mxu1 %v1778_v44  ;;  %v196_v43 = vsub.s32 1, %v191_v39  ;;  %v204_v44 = vsub.s32 3, %v191_v39 }
  0x9e   :  { %925 = vmatprep.subr.bf16.mxu0 %v1783_v45  ;;  %1007 = vmatprep.subr.bf16.mxu1 %v1786_v46  ;;  %v193_v45 = vrot.slane %v188_v42, %v192_v40  ;;  %v201_v46 = vrot.slane %v188_v42, %v200_v41 }
  0xa1   :  { %926 = vmatpush1.bf16.msra.mxu0 %v1781_v47  ;;  %1008 = vmatpush1.bf16.msra.mxu1 %v1784_v48  ;;  %v197_v47 = vrot.slane %v188_v42, %v196_v43  ;;  %v205_v48 = vrot.slane %v188_v42, %v204_v44 }
  0xa2   :  { %927 = vmatprep.subr.bf16.mxu0 %v1789_v49  ;;  %1009 = vmatprep.subr.bf16.mxu1 %v1792_v50 }
  0xa5   :  { %928 = vmatpush1.bf16.msra.mxu0 %v1787_v51  ;;  %1010 = vmatpush1.bf16.msra.mxu1 %v1790_v52 }
  0xa6   :  { %929 = vmatprep.subr.bf16.mxu0 %v1795_v53  ;;  %1011 = vmatprep.subr.bf16.mxu1 %v1798_v54 }
  0xa9   :  { %930 = vmatpush1.bf16.msra.mxu0 %v1793_v55  ;;  %1012 = vmatpush1.bf16.msra.mxu1 %v1796_v56 }
  0xaa   :  { %931 = vmatprep.subr.bf16.mxu0 %v1801_v57  ;;  %1013 = vmatprep.subr.bf16.mxu1 %v1804_v58 }
  0xad   :  { %932 = vmatpush1.bf16.msra.mxu0 %v1799_v59  ;;  %1014 = vmatpush1.bf16.msra.mxu1 %v1802_v60 }
  0xae   :  { %933 = vmatprep.subr.bf16.mxu0 %v1807_v61  ;;  %1015 = vmatprep.subr.bf16.mxu1 %v1810_v62 }
  0xb1   :  { %934 = vmatpush1.bf16.msra.mxu0 %v1805_v63  ;;  %1016 = vmatpush1.bf16.msra.mxu1 %v1808_v0 }
  0xb2   :  { %935 = vmatprep.subr.bf16.mxu0 %v1813_v1  ;;  %1017 = vmatprep.subr.bf16.mxu1 %v1816_v2 }
  0xb5   :  { %936 = vmatpush1.bf16.msra.mxu0 %v1811_v3  ;;  %1018 = vmatpush1.bf16.msra.mxu1 %v1814_v4 }
  0xb6   :  { %1559 = vmatprep.subr.bf16.mxu0 %v1819_v5  ;;  %1581 = vmatprep.subr.bf16.mxu1 %v1820_v6 }
  0xb8   :  { %938 = vmatmul.mubr.bf16.vlgmr.msra.gmra.mrb[0].mxu0 %v1396_v7  ;;  %1020 = vmatmul.mubr.bf16.vlgmr.msra.gmra.mrb[0].mxu1 %v1396_v7  ;;  %v1526_v7 = vld [vmem:[%s2041_s3 + $0x1] ss:$0 sm:$0xff] }
  0xb9   :  { %1560 = vmatpush3.bf16.msra.mxu0 %v1821_v8  ;;  %1582 = vmatpush3.bf16.msra.mxu1 %v1822_v9 }
  0xba   :  { %1561 = vmatprep.subr.bf16.mxu0 %v1823_v10  ;;  %1583 = vmatprep.subr.bf16.mxu1 %v1824_v11 }
  0xbd   :  { %1562 = vmatpush3.bf16.msra.mxu0 %v1825_v12  ;;  %1584 = vmatpush3.bf16.msra.mxu1 %v1826_v13 }
  0xbe   :  { %1563 = vmatprep.subr.bf16.mxu0 %v1827_v14  ;;  %1585 = vmatprep.subr.bf16.mxu1 %v1828_v15 }
  0xc1   :  { %1564 = vmatpush3.bf16.msra.mxu0 %v1829_v16  ;;  %1586 = vmatpush3.bf16.msra.mxu1 %v1830_v17 }
  0xc2   :  { %1565 = vmatprep.subr.bf16.mxu0 %v1831_v18  ;;  %1587 = vmatprep.subr.bf16.mxu1 %v1832_v19 }
  0xc5   :  { %1566 = vmatpush3.bf16.msra.mxu0 %v1833_v20  ;;  %1588 = vmatpush3.bf16.msra.mxu1 %v1834_v21 }
  0xc6   :  { %1567 = vmatprep.subr.bf16.mxu0 %v1835_v22  ;;  %1589 = vmatprep.subr.bf16.mxu1 %v1836_v23 }
  0xc9   :  { %1568 = vmatpush3.bf16.msra.mxu0 %v1837_v24  ;;  %1590 = vmatpush3.bf16.msra.mxu1 %v1838_v25 }
  0xca   :  { %1569 = vmatprep.subr.bf16.mxu0 %v1839_v26  ;;  %1591 = vmatprep.subr.bf16.mxu1 %v1840_v27 }
  0xcd   :  { %1570 = vmatpush3.bf16.msra.mxu0 %v1841_v28  ;;  %1592 = vmatpush3.bf16.msra.mxu1 %v1842_v29 }
  0xce   :  { %1571 = vmatprep.subr.bf16.mxu0 %v1843_v30  ;;  %1593 = vmatprep.subr.bf16.mxu1 %v1844_v31 }
  0xd1   :  { %1572 = vmatpush3.bf16.msra.mxu0 %v1845_v32  ;;  %1594 = vmatpush3.bf16.msra.mxu1 %v1846_v33 }
  0xd2   :  { %1573 = vmatprep.subr.bf16.mxu0 %v1847_v34  ;;  %1595 = vmatprep.subr.bf16.mxu1 %v1848_v35 }
  0xd5   :  { %1574 = vmatpush3.bf16.msra.mxu0 %v1849_v36  ;;  %1596 = vmatpush3.bf16.msra.mxu1 %v1850_v37 }
 0x18b   :  { %v939_v49 = vpop.f32.mrb[0].mxu0  ;;  %v1021_v50 = vpop.f32.mrb[0].mxu1 }
 0x18c   :  { %v1603_v51 = vadd.f32 %v939_v49, %v193_v45  ;;  %v1605_v52 = vadd.f32 %v1021_v50, %v201_v46  ;;  %v941_v53 = vpop.f32.mrb[1].mxu0  ;;  %v1023_v54 = vpop.f32.mrb[1].mxu1 }
 0x18d   :  { %v1604_v55 = vadd.f32 %v941_v53, %v197_v47  ;;  %v1606_v56 = vadd.f32 %v1023_v54, %v205_v48  ;;  %v943_v57 = vpop.f32.mrb[2].mxu0  ;;  %v1025_v58 = vpop.f32.mrb[2].mxu1 }
 0x18e   :  { %v1028_v59 = vmax.f32 %v1603_v51, 0.0  ;;  %v1030_v60 = vmax.f32 %v1605_v52, 0.0  ;;  %v944_v61 = vpop.f32.mrb[3].mxu0  ;;  %v1026_v62 = vpop.f32.mrb[3].mxu1 }
 0x18f   :  { %v1029_v63 = vmax.f32 %v1604_v55, 0.0  ;;  %v1031_v0 = vmax.f32 %v1606_v56, 0.0 }
 0x190   :  { %v1032_v3 = vpack.c.bf16 %v1028_v59, %v1028_v59  ;;  %v1034_v4 = vpack.c.bf16 %v1030_v60, %v1030_v60 }
 0x191   :  { %v1033_v1 = vpack.c.bf16 %v1029_v63, %v1029_v63  ;;  %v1035_v2 = vpack.c.bf16 %v1031_v0, %v1031_v0 }
 0x193   :  { %1329 = vmatprep.mubr.bf16.mxu0 %v1033_v1  ;;  %1369 = vmatprep.mubr.bf16.mxu1 %v1035_v2 }
 0x194   :  { %1330 = vmatmul.mubr.bf16.vlgmr.msra.gmra.mrb[4].mxu0 %v1032_v3  ;;  %1370 = vmatmul.mubr.bf16.vlgmr.msra.gmra.mrb[4].mxu1 %v1034_v4 }
 0x267   :  { %v1575_v5 = vpop.f32.mrb[4].mxu0  ;;  %v1597_v6 = vpop.f32.mrb[4].mxu1 }
 0x268   :  { %v1576_v8 = vpop.f32.mrb[5].mxu0  ;;  %v1598_v9 = vpop.f32.mrb[5].mxu1 }
 0x269   :  { %v1577_v10 = vadd.f32 %v1576_v8, %v1575_v5  ;;  %v1599_v11 = vadd.f32 %v1598_v9, %v1597_v6  ;;  %v1578_v12 = vpop.f32.mrb[6].mxu0  ;;  %v1600_v13 = vpop.f32.mrb[6].mxu1 }
 0x26a   :  { %v1579_v14 = vpop.f32.mrb[7].mxu0  ;;  %v1601_v15 = vpop.f32.mrb[7].mxu1 }
 0x26b   :  { %v1332_v16 = vadd.f32 %v1577_v10, %v1526_v7 }
 0x26d   :  { %v1372_v17 = vadd.f32 %v1599_v11, %v1332_v16 }
 0x26f   :  { %1377 = vst [vmem:[#allocation8] sm:$0xff] %v1372_v17 }
 0x270   :  { %1928 = shalt.err (!%p1925_p0)
}
 0x271   :  { %s1929_s8 = scalar_lea.hbm %s2042_s4, 128 }
 0x272   :  { %p1930_p1 = scmp.ne.s32.totalorder %s2042_s4, %s1929_s8  ;;  %p1933_p2 = scmp.lt.u32.totalorder %s1929_s8, %s2042_s4 }
 0x274   :  { %p1935_p3 = pnand %p1933_p2, %p1930_p1 }
 0x276   :  { %1938 = shalt.err (!%p1935_p3)
}
 0x277   :  { %1387 = dma.vmem_to_hbm [thread:$0]  %s1385_s5, 128, %s2042_s4, [#allocation4]  }
 0x278   :  { %1943 = dma.done.wait [#allocation4], 128  }
 0x279   :  { %1944 = vsyncadd [#allocation4], 4294967168 }
 0x27a   :  { %1391 = vsyncpa [#allocation3], 1 }
 0x27b   :  { %1392 = vsyncpa [#allocation6], 1 }
 0x27c   :  { %1393 = vsyncpa [#allocation4], 1 }

</bundles_post_ra>
